<compile_context>
chip_gen: v7x
topology: tpu7x:2x2x1
jax: 0.10.0
libtpu: 0.0.40
codegen_flags: <defaults>
</compile_context>

<pallas_src>
import math

import jax
import jax.numpy as jnp
import numpy as np
from jax.experimental import pallas as pl
from jax.experimental.pallas import tpu as pltpu


def make_decoder_kernel(num_layers, output_len, batch, output_dim):
    """Fused stacked-RNN(tanh) + final Linear.

    Kernel arg order: x, (wih, whh, b) * num_layers, wfc, bfc, out(B, T*O)
    """
    T = output_len
    B = batch
    O = output_dim

    def kernel(*refs):
        x_ref = refs[0]
        layer_refs = refs[1:1 + 3 * num_layers]
        wfc_ref = refs[1 + 3 * num_layers]
        bfc_ref = refs[2 + 3 * num_layers]
        out_ref = refs[3 + 3 * num_layers]            # (B, T*O)

        # ---------------- hoisted, loop-invariant work ----------------
        # Same input at every timestep -> layer-0 input projection (+bias) once.
        wih0_ref, whh0_ref, b0_ref = layer_refs[0:3]
        xproj = (
            jnp.dot(x_ref[...], wih0_ref[...], preferred_element_type=jnp.float32)
            + b0_ref[...]
        )
        whh0 = whh0_ref[...]

        # Layers i>0: stack [wih; whh] ONCE so the per-step recurrence needs a
        # single MXU op.  (Row-concat of 32-row operands is tile-aligned.)
        wih, wcat, b_bc = [None], [None], [None]
        for i in range(1, num_layers):
            wih_ref, whh_ref, b_ref = layer_refs[3 * i:3 * i + 3]
            wih.append(wih_ref[...])                                   # t == 0 only
            wcat.append(jnp.concatenate([wih_ref[...], whh_ref[...]], axis=0))
            b_bc.append(jnp.broadcast_to(b_ref[...], (B, whh_ref.shape[1])))

        wfc = wfc_ref[...]
        bfc_bc = jnp.broadcast_to(bfc_ref[...], (B, O))

        # ---------------- recurrence (fully unrolled, state in vregs) ----
        h_prev = [None] * num_layers
        ys = []
        for t in range(T):
            inp = None
            for i in range(num_layers):
                if i == 0:
                    if t == 0:
                        h = jnp.tanh(xproj)                 # h_{-1} = 0 shortcut
                    else:
                        h = jnp.tanh(
                            xproj
                            + jnp.dot(h_prev[0], whh0,
                                      preferred_element_type=jnp.float32))
                else:
                    if t == 0:
                        h = jnp.tanh(
                            jnp.dot(inp, wih[i],
                                    preferred_element_type=jnp.float32) + b_bc[i])
                    else:
                        z = jnp.concatenate([inp, h_prev[i]], axis=1)   # lane concat
                        h = jnp.tanh(
                            jnp.dot(z, wcat[i],
                                    preferred_element_type=jnp.float32) + b_bc[i])
                h_prev[i] = h
                inp = h
            # Final Linear for this step; independent of the recurrence chain, so
            # its MXU latency overlaps the next step's serial work.
            ys.append(jnp.dot(inp, wfc, preferred_element_type=jnp.float32) + bfc_bc)

        # Single store: row b = [y_0[b], y_1[b], ..., y_{T-1}[b]]  (batch-major).
        out_ref[...] = jnp.concatenate(ys, axis=1).astype(out_ref.dtype)

    return kernel


def sequence_decoder_forward(x, layer_params, fc_params, output_len):
    B, _ = x.shape
    num_layers = len(layer_params)
    wfc, bfc = fc_params
    output_dim = wfc.shape[1]

    flat_inputs = [x]
    for (wih, whh, b) in layer_params:
        flat_inputs += [wih, whh, b]
    flat_inputs += [wfc, bfc]

    kernel = make_decoder_kernel(num_layers, output_len, B, output_dim)
    vmem = pltpu.MemorySpace.VMEM

    out2d = pl.pallas_call(
        kernel,
        out_shape=jax.ShapeDtypeStruct((B, output_len * output_dim), jnp.float32),
        in_specs=[pl.BlockSpec(memory_space=vmem) for _ in flat_inputs],
        out_specs=pl.BlockSpec(memory_space=vmem),
    )(*flat_inputs)
    # Free contiguous reshape (no transpose): already batch-first.
    return out2d.reshape(B, output_len, output_dim)


def init_params(key, input_dim, hidden_dims, output_dim):
    """Deterministic init mimicking PyTorch's U(-1/sqrt(h), 1/sqrt(h))."""
    layer_params = []
    in_dim = input_dim
    for h in hidden_dims:
        bound = 1.0 / math.sqrt(h)
        key, k1, k2, k3, k4 = jax.random.split(key, 5)
        wih = jax.random.uniform(k1, (in_dim, h), jnp.float32, -bound, bound)
        whh = jax.random.uniform(k2, (h, h), jnp.float32, -bound, bound)
        bih = jax.random.uniform(k3, (h,), jnp.float32, -bound, bound)
        bhh = jax.random.uniform(k4, (h,), jnp.float32, -bound, bound)
        b = (bih + bhh).reshape(1, h)  # combined bias (mathematically identical)
        layer_params.append((wih, whh, b))
        in_dim = h
    bound = 1.0 / math.sqrt(in_dim)
    key, k1, k2 = jax.random.split(key, 3)
    wfc = jax.random.uniform(k1, (in_dim, output_dim), jnp.float32, -bound, bound)
    bfc = jax.random.uniform(k2, (output_dim,), jnp.float32, -bound, bound)
    return layer_params, (wfc, bfc.reshape(1, output_dim))


def ref_forward(x, layer_params, fc_params, output_len):
    """Pure-JAX reference of SeqenceDecoder.forward (RNN cells, tanh)."""
    B, d = x.shape
    seq = jnp.broadcast_to(x[:, None, :], (B, output_len, d))
    for (wih, whh, b) in layer_params:
        h = jnp.zeros((B, wih.shape[1]), jnp.float32)
        outs = []
        for t in range(output_len):
            h = jnp.tanh(seq[:, t] @ wih + b + h @ whh)
            outs.append(h)
        seq = jnp.stack(outs, axis=1)
    wfc, bfc = fc_params
    return seq @ wfc + bfc


if __name__ == "__main__":
    B = 2
    input_dim = 4
    output_dim = 4
    output_len = 8
    hidden_dims = [32, 32]

    key = jax.random.PRNGKey(0)
    key, xk = jax.random.split(key)
    x = jax.random.normal(xk, (B, input_dim), jnp.float32)
    layer_params, fc_params = init_params(key, input_dim, hidden_dims, output_dim)

    out = sequence_decoder_forward(x, layer_params, fc_params, output_len)
    out = jax.block_until_ready(out)

    ref = ref_forward(x, layer_params, fc_params, output_len)
    assert out.shape == (B, output_len, output_dim), out.shape
    np.testing.assert_allclose(np.asarray(out), np.asarray(ref), rtol=1e-5, atol=1e-5)
    print("KERNEL_OK")
</pallas_src>

<mosaic_0001>
module attributes {stable_mosaic.version = 11 : i64} {
  func.func @kernel(%arg0: memref<2x4xf32, #tpu.memory_space<vmem>>, %arg1: memref<4x32xf32, #tpu.memory_space<vmem>>, %arg2: memref<32x32xf32, #tpu.memory_space<vmem>>, %arg3: memref<1x32xf32, #tpu.memory_space<vmem>>, %arg4: memref<32x32xf32, #tpu.memory_space<vmem>>, %arg5: memref<32x32xf32, #tpu.memory_space<vmem>>, %arg6: memref<1x32xf32, #tpu.memory_space<vmem>>, %arg7: memref<32x4xf32, #tpu.memory_space<vmem>>, %arg8: memref<1x4xf32, #tpu.memory_space<vmem>>, %arg9: memref<2x32xf32, #tpu.memory_space<vmem>>) attributes {dimension_semantics = [], scalar_prefetch = 0 : i64, scratch_operands = 0 : i64, tpu.core_type = #tpu.core_type<tc>} {
    %c0 = arith.constant 0 : index
    %c0_0 = arith.constant 0 : index
    %0 = vector.load %arg0[%c0, %c0_0] : memref<2x4xf32, #tpu.memory_space<vmem>>, vector<2x4xf32>
    %c0_1 = arith.constant 0 : index
    %c0_2 = arith.constant 0 : index
    %1 = vector.load %arg1[%c0_1, %c0_2] : memref<4x32xf32, #tpu.memory_space<vmem>>, vector<4x32xf32>
    %cst = arith.constant dense<0.000000e+00> : vector<2x32xf32>
    %2 = tpu.matmul %0, %1, %cst {dimension_numbers = #tpu.dot_dimension_numbers<[1], [0], [0], [1], [0, 0, 1, 1], [], []>} : vector<2x4xf32>, vector<4x32xf32>, vector<2x32xf32> -> vector<2x32xf32>
    %c0_3 = arith.constant 0 : index
    %c0_4 = arith.constant 0 : index
    %3 = vector.load %arg3[%c0_3, %c0_4] : memref<1x32xf32, #tpu.memory_space<vmem>>, vector<1x32xf32>
    %4 = vector.broadcast %3 : vector<1x32xf32> to vector<2x32xf32>
    %5 = arith.addf %2, %4 : vector<2x32xf32>
    %c0_5 = arith.constant 0 : index
    %c0_6 = arith.constant 0 : index
    %6 = vector.load %arg2[%c0_5, %c0_6] : memref<32x32xf32, #tpu.memory_space<vmem>>, vector<32x32xf32>
    %c0_7 = arith.constant 0 : index
    %c0_8 = arith.constant 0 : index
    %7 = vector.load %arg4[%c0_7, %c0_8] : memref<32x32xf32, #tpu.memory_space<vmem>>, vector<32x32xf32>
    %c0_9 = arith.constant 0 : index
    %c0_10 = arith.constant 0 : index
    %8 = vector.load %arg4[%c0_9, %c0_10] : memref<32x32xf32, #tpu.memory_space<vmem>>, vector<32x32xf32>
    %c0_11 = arith.constant 0 : index
    %c0_12 = arith.constant 0 : index
    %9 = vector.load %arg5[%c0_11, %c0_12] : memref<32x32xf32, #tpu.memory_space<vmem>>, vector<32x32xf32>
    %10 = tpu.concatenate %8, %9 in 0 : vector<32x32xf32>, vector<32x32xf32> -> vector<64x32xf32>
    %c0_13 = arith.constant 0 : index
    %c0_14 = arith.constant 0 : index
    %11 = vector.load %arg6[%c0_13, %c0_14] : memref<1x32xf32, #tpu.memory_space<vmem>>, vector<1x32xf32>
    %12 = vector.shape_cast %11 : vector<1x32xf32> to vector<1x32xf32>
    %13 = vector.broadcast %12 : vector<1x32xf32> to vector<2x32xf32>
    %c0_15 = arith.constant 0 : index
    %c0_16 = arith.constant 0 : index
    %14 = vector.load %arg7[%c0_15, %c0_16] : memref<32x4xf32, #tpu.memory_space<vmem>>, vector<32x4xf32>
    %c0_17 = arith.constant 0 : index
    %c0_18 = arith.constant 0 : index
    %15 = vector.load %arg8[%c0_17, %c0_18] : memref<1x4xf32, #tpu.memory_space<vmem>>, vector<1x4xf32>
    %16 = vector.shape_cast %15 : vector<1x4xf32> to vector<1x4xf32>
    %17 = vector.broadcast %16 : vector<1x4xf32> to vector<2x4xf32>
    %18 = math.tanh %5 : vector<2x32xf32>
    %cst_19 = arith.constant dense<0.000000e+00> : vector<2x32xf32>
    %19 = tpu.matmul %18, %7, %cst_19 {dimension_numbers = #tpu.dot_dimension_numbers<[1], [0], [0], [1], [0, 0, 1, 1], [], []>} : vector<2x32xf32>, vector<32x32xf32>, vector<2x32xf32> -> vector<2x32xf32>
    %20 = arith.addf %19, %13 : vector<2x32xf32>
    %21 = math.tanh %20 : vector<2x32xf32>
    %cst_20 = arith.constant dense<0.000000e+00> : vector<2x4xf32>
    %22 = tpu.matmul %21, %14, %cst_20 {dimension_numbers = #tpu.dot_dimension_numbers<[1], [0], [0], [1], [0, 0, 1, 1], [], []>} : vector<2x32xf32>, vector<32x4xf32>, vector<2x4xf32> -> vector<2x4xf32>
    %23 = arith.addf %22, %17 : vector<2x4xf32>
    %cst_21 = arith.constant dense<0.000000e+00> : vector<2x32xf32>
    %24 = tpu.matmul %18, %6, %cst_21 {dimension_numbers = #tpu.dot_dimension_numbers<[1], [0], [0], [1], [0, 0, 1, 1], [], []>} : vector<2x32xf32>, vector<32x32xf32>, vector<2x32xf32> -> vector<2x32xf32>
    %25 = arith.addf %5, %24 : vector<2x32xf32>
    %26 = math.tanh %25 : vector<2x32xf32>
    %27 = tpu.concatenate %26, %21 in 1 : vector<2x32xf32>, vector<2x32xf32> -> vector<2x64xf32>
    %cst_22 = arith.constant dense<0.000000e+00> : vector<2x32xf32>
    %28 = tpu.matmul %27, %10, %cst_22 {dimension_numbers = #tpu.dot_dimension_numbers<[1], [0], [0], [1], [0, 0, 1, 1], [], []>} : vector<2x64xf32>, vector<64x32xf32>, vector<2x32xf32> -> vector<2x32xf32>
    %29 = arith.addf %28, %13 : vector<2x32xf32>
    %30 = math.tanh %29 : vector<2x32xf32>
    %cst_23 = arith.constant dense<0.000000e+00> : vector<2x4xf32>
    %31 = tpu.matmul %30, %14, %cst_23 {dimension_numbers = #tpu.dot_dimension_numbers<[1], [0], [0], [1], [0, 0, 1, 1], [], []>} : vector<2x32xf32>, vector<32x4xf32>, vector<2x4xf32> -> vector<2x4xf32>
    %32 = arith.addf %31, %17 : vector<2x4xf32>
    %cst_24 = arith.constant dense<0.000000e+00> : vector<2x32xf32>
    %33 = tpu.matmul %26, %6, %cst_24 {dimension_numbers = #tpu.dot_dimension_numbers<[1], [0], [0], [1], [0, 0, 1, 1], [], []>} : vector<2x32xf32>, vector<32x32xf32>, vector<2x32xf32> -> vector<2x32xf32>
    %34 = arith.addf %5, %33 : vector<2x32xf32>
    %35 = math.tanh %34 : vector<2x32xf32>
    %36 = tpu.concatenate %35, %30 in 1 : vector<2x32xf32>, vector<2x32xf32> -> vector<2x64xf32>
    %cst_25 = arith.constant dense<0.000000e+00> : vector<2x32xf32>
    %37 = tpu.matmul %36, %10, %cst_25 {dimension_numbers = #tpu.dot_dimension_numbers<[1], [0], [0], [1], [0, 0, 1, 1], [], []>} : vector<2x64xf32>, vector<64x32xf32>, vector<2x32xf32> -> vector<2x32xf32>
    %38 = arith.addf %37, %13 : vector<2x32xf32>
    %39 = math.tanh %38 : vector<2x32xf32>
    %cst_26 = arith.constant dense<0.000000e+00> : vector<2x4xf32>
    %40 = tpu.matmul %39, %14, %cst_26 {dimension_numbers = #tpu.dot_dimension_numbers<[1], [0], [0], [1], [0, 0, 1, 1], [], []>} : vector<2x32xf32>, vector<32x4xf32>, vector<2x4xf32> -> vector<2x4xf32>
    %41 = arith.addf %40, %17 : vector<2x4xf32>
    %cst_27 = arith.constant dense<0.000000e+00> : vector<2x32xf32>
    %42 = tpu.matmul %35, %6, %cst_27 {dimension_numbers = #tpu.dot_dimension_numbers<[1], [0], [0], [1], [0, 0, 1, 1], [], []>} : vector<2x32xf32>, vector<32x32xf32>, vector<2x32xf32> -> vector<2x32xf32>
    %43 = arith.addf %5, %42 : vector<2x32xf32>
    %44 = math.tanh %43 : vector<2x32xf32>
    %45 = tpu.concatenate %44, %39 in 1 : vector<2x32xf32>, vector<2x32xf32> -> vector<2x64xf32>
    %cst_28 = arith.constant dense<0.000000e+00> : vector<2x32xf32>
    %46 = tpu.matmul %45, %10, %cst_28 {dimension_numbers = #tpu.dot_dimension_numbers<[1], [0], [0], [1], [0, 0, 1, 1], [], []>} : vector<2x64xf32>, vector<64x32xf32>, vector<2x32xf32> -> vector<2x32xf32>
    %47 = arith.addf %46, %13 : vector<2x32xf32>
    %48 = math.tanh %47 : vector<2x32xf32>
    %cst_29 = arith.constant dense<0.000000e+00> : vector<2x4xf32>
    %49 = tpu.matmul %48, %14, %cst_29 {dimension_numbers = #tpu.dot_dimension_numbers<[1], [0], [0], [1], [0, 0, 1, 1], [], []>} : vector<2x32xf32>, vector<32x4xf32>, vector<2x4xf32> -> vector<2x4xf32>
    %50 = arith.addf %49, %17 : vector<2x4xf32>
    %cst_30 = arith.constant dense<0.000000e+00> : vector<2x32xf32>
    %51 = tpu.matmul %44, %6, %cst_30 {dimension_numbers = #tpu.dot_dimension_numbers<[1], [0], [0], [1], [0, 0, 1, 1], [], []>} : vector<2x32xf32>, vector<32x32xf32>, vector<2x32xf32> -> vector<2x32xf32>
    %52 = arith.addf %5, %51 : vector<2x32xf32>
    %53 = math.tanh %52 : vector<2x32xf32>
    %54 = tpu.concatenate %53, %48 in 1 : vector<2x32xf32>, vector<2x32xf32> -> vector<2x64xf32>
    %cst_31 = arith.constant dense<0.000000e+00> : vector<2x32xf32>
    %55 = tpu.matmul %54, %10, %cst_31 {dimension_numbers = #tpu.dot_dimension_numbers<[1], [0], [0], [1], [0, 0, 1, 1], [], []>} : vector<2x64xf32>, vector<64x32xf32>, vector<2x32xf32> -> vector<2x32xf32>
    %56 = arith.addf %55, %13 : vector<2x32xf32>
    %57 = math.tanh %56 : vector<2x32xf32>
    %cst_32 = arith.constant dense<0.000000e+00> : vector<2x4xf32>
    %58 = tpu.matmul %57, %14, %cst_32 {dimension_numbers = #tpu.dot_dimension_numbers<[1], [0], [0], [1], [0, 0, 1, 1], [], []>} : vector<2x32xf32>, vector<32x4xf32>, vector<2x4xf32> -> vector<2x4xf32>
    %59 = arith.addf %58, %17 : vector<2x4xf32>
    %cst_33 = arith.constant dense<0.000000e+00> : vector<2x32xf32>
    %60 = tpu.matmul %53, %6, %cst_33 {dimension_numbers = #tpu.dot_dimension_numbers<[1], [0], [0], [1], [0, 0, 1, 1], [], []>} : vector<2x32xf32>, vector<32x32xf32>, vector<2x32xf32> -> vector<2x32xf32>
    %61 = arith.addf %5, %60 : vector<2x32xf32>
    %62 = math.tanh %61 : vector<2x32xf32>
    %63 = tpu.concatenate %62, %57 in 1 : vector<2x32xf32>, vector<2x32xf32> -> vector<2x64xf32>
    %cst_34 = arith.constant dense<0.000000e+00> : vector<2x32xf32>
    %64 = tpu.matmul %63, %10, %cst_34 {dimension_numbers = #tpu.dot_dimension_numbers<[1], [0], [0], [1], [0, 0, 1, 1], [], []>} : vector<2x64xf32>, vector<64x32xf32>, vector<2x32xf32> -> vector<2x32xf32>
    %65 = arith.addf %64, %13 : vector<2x32xf32>
    %66 = math.tanh %65 : vector<2x32xf32>
    %cst_35 = arith.constant dense<0.000000e+00> : vector<2x4xf32>
    %67 = tpu.matmul %66, %14, %cst_35 {dimension_numbers = #tpu.dot_dimension_numbers<[1], [0], [0], [1], [0, 0, 1, 1], [], []>} : vector<2x32xf32>, vector<32x4xf32>, vector<2x4xf32> -> vector<2x4xf32>
    %68 = arith.addf %67, %17 : vector<2x4xf32>
    %cst_36 = arith.constant dense<0.000000e+00> : vector<2x32xf32>
    %69 = tpu.matmul %62, %6, %cst_36 {dimension_numbers = #tpu.dot_dimension_numbers<[1], [0], [0], [1], [0, 0, 1, 1], [], []>} : vector<2x32xf32>, vector<32x32xf32>, vector<2x32xf32> -> vector<2x32xf32>
    %70 = arith.addf %5, %69 : vector<2x32xf32>
    %71 = math.tanh %70 : vector<2x32xf32>
    %72 = tpu.concatenate %71, %66 in 1 : vector<2x32xf32>, vector<2x32xf32> -> vector<2x64xf32>
    %cst_37 = arith.constant dense<0.000000e+00> : vector<2x32xf32>
    %73 = tpu.matmul %72, %10, %cst_37 {dimension_numbers = #tpu.dot_dimension_numbers<[1], [0], [0], [1], [0, 0, 1, 1], [], []>} : vector<2x64xf32>, vector<64x32xf32>, vector<2x32xf32> -> vector<2x32xf32>
    %74 = arith.addf %73, %13 : vector<2x32xf32>
    %75 = math.tanh %74 : vector<2x32xf32>
    %cst_38 = arith.constant dense<0.000000e+00> : vector<2x4xf32>
    %76 = tpu.matmul %75, %14, %cst_38 {dimension_numbers = #tpu.dot_dimension_numbers<[1], [0], [0], [1], [0, 0, 1, 1], [], []>} : vector<2x32xf32>, vector<32x4xf32>, vector<2x4xf32> -> vector<2x4xf32>
    %77 = arith.addf %76, %17 : vector<2x4xf32>
    %cst_39 = arith.constant dense<0.000000e+00> : vector<2x32xf32>
    %78 = tpu.matmul %71, %6, %cst_39 {dimension_numbers = #tpu.dot_dimension_numbers<[1], [0], [0], [1], [0, 0, 1, 1], [], []>} : vector<2x32xf32>, vector<32x32xf32>, vector<2x32xf32> -> vector<2x32xf32>
    %79 = arith.addf %5, %78 : vector<2x32xf32>
    %80 = math.tanh %79 : vector<2x32xf32>
    %81 = tpu.concatenate %80, %75 in 1 : vector<2x32xf32>, vector<2x32xf32> -> vector<2x64xf32>
    %cst_40 = arith.constant dense<0.000000e+00> : vector<2x32xf32>
    %82 = tpu.matmul %81, %10, %cst_40 {dimension_numbers = #tpu.dot_dimension_numbers<[1], [0], [0], [1], [0, 0, 1, 1], [], []>} : vector<2x64xf32>, vector<64x32xf32>, vector<2x32xf32> -> vector<2x32xf32>
    %83 = arith.addf %82, %13 : vector<2x32xf32>
    %84 = math.tanh %83 : vector<2x32xf32>
    %cst_41 = arith.constant dense<0.000000e+00> : vector<2x4xf32>
    %85 = tpu.matmul %84, %14, %cst_41 {dimension_numbers = #tpu.dot_dimension_numbers<[1], [0], [0], [1], [0, 0, 1, 1], [], []>} : vector<2x32xf32>, vector<32x4xf32>, vector<2x4xf32> -> vector<2x4xf32>
    %86 = arith.addf %85, %17 : vector<2x4xf32>
    %87 = tpu.concatenate %23, %32, %41, %50, %59, %68, %77, %86 in 1 : vector<2x4xf32>, vector<2x4xf32>, vector<2x4xf32>, vector<2x4xf32>, vector<2x4xf32>, vector<2x4xf32>, vector<2x4xf32>, vector<2x4xf32> -> vector<2x32xf32>
    %c0_42 = arith.constant 0 : index
    %c0_43 = arith.constant 0 : index
    %88 = vector.load %arg9[%c0_42, %c0_43] : memref<2x32xf32, #tpu.memory_space<vmem>>, vector<2x32xf32>
    tpu.vector_store %arg9[%c0_42, %c0_43], %87 {strides = array<i32>} : memref<2x32xf32, #tpu.memory_space<vmem>>, vector<2x32xf32>,
    return
  }
}

</mosaic_0001>

<bundles_post_ra>
// kernel: tpu_custom_call.1
= control target key start
LH: loop header
LB: loop body
LE: loop exit
PB: predicated region body
PF: predicated region fallthrough
CT: control target
= control target key end

     0   :  { %14 = vsyncpa [#allocation3], 0  ;;  %s3164_s0 = inlined_call_operand.vmem [shape: f32[2,4], index: 0, kind: input, shape index: {}]   ;;  %s3165_s1 = inlined_call_operand.vmem [shape: f32[4,32], index: 1, kind: input, shape index: {}]   ;;  %s3166_s2 = inlined_call_operand.vmem [shape: f32[32,32], index: 2, kind: input, shape index: {}]   ;;  %s3167_s3 = inlined_call_operand.vmem [shape: f32[1,32], index: 3, kind: input, shape index: {}]   ;;  %s3168_s4 = inlined_call_operand.hbm [shape: f32[32,32], index: 4, kind: input, shape index: {}]   ;;  %s3169_s5 = inlined_call_operand.hbm [shape: f32[32,32], index: 5, kind: input, shape index: {}]   ;;  %s3170_s6 = inlined_call_operand.vmem [shape: f32[1,32], index: 6, kind: input, shape index: {}]   ;;  %s3171_s7 = inlined_call_operand.vmem [shape: f32[32,4], index: 7, kind: input, shape index: {}]   ;;  %s3172_s8 = inlined_call_operand.vmem [shape: f32[1,4], index: 8, kind: input, shape index: {}]   ;;  %s3173_s9 = inlined_call_operand.hbm [shape: f32[2,32], index: 9, kind: output, shape index: {}]  }
   0x1   :  { %15 = vsyncpa [#allocation6], 0 }
   0x2   :  { %16 = vsyncpa [#allocation4], 0  ;;  %s2752_s30 = smov [#allocation2]   ;;  %s2680_s13 = scalar_lea.hbm %s3168_s4, 512 }
   0x3   :  { %s30_s10 = sshll.u32 %s2752_s30, 4  ;;  %p2681_p0 = scmp.ne.s32.totalorder %s3168_s4, %s2680_s13  ;;  %s31_s10 = int_to_ptr.vmem [resolvable:$true] %s30_s10 }
   0x4   :  { %p2684_p1 = scmp.lt.u32.totalorder %s2680_s13, %s3168_s4 }
   0x6   :  { %p2686_p2 = pnand %p2684_p1, %p2681_p0 }
   0x8   :  { %2689 = shalt.err (!%p2686_p2)
}
   0x9   :  { %s2690_s18 = scalar_lea.vmem %s31_s10, 512  ;;  %p2695_p4 = scmp.lt.s32.totalorder %s31_s10, %s31_s10 }
   0xa   :  { %p2691_p3 = scmp.ne.s32.totalorder %s31_s10, %s2690_s18  ;;  %p2696_p5 = scmp.lt.s32.totalorder %s2690_s18, %s2690_s18 }
   0xc   :  { %p2697_p6 = por %p2696_p5, %p2695_p4 }
   0xe   :  { %p2698_p7 = pnand %p2697_p6, %p2691_p3 }
  0x10   :  { %2701 = shalt.err (!%p2698_p7)
}
  0x11   :  { %s2753_s19 = smov 128   ;;  %s2754_s20 = smov 8  }
  0x12   :  { %36 = dma.hbm_to_vmem [thread:$0]  %s3168_s4, 512, %s31_s10, [#allocation3], %s2753_s19, %s2753_s19, %s2754_s20  }
  0x13   :  { %s2755_s23 = smov [#allocation5]   ;;  %s2702_s27 = scalar_lea.hbm %s3169_s5, 512 }
  0x14   :  { %s42_s24 = sshll.u32 %s2755_s23, 4  ;;  %p2703_p8 = scmp.ne.s32.totalorder %s3169_s5, %s2702_s27  ;;  %s43_s24 = int_to_ptr.vmem [resolvable:$true] %s42_s24 }
  0x15   :  { %p2706_p9 = scmp.lt.u32.totalorder %s2702_s27, %s3169_s5 }
  0x17   :  { %p2708_p10 = pnand %p2706_p9, %p2703_p8 }
  0x19   :  { %2711 = shalt.err (!%p2708_p10)
}
  0x1a   :  { %s2712_s12 = scalar_lea.vmem %s43_s24, 512  ;;  %p2717_p12 = scmp.lt.s32.totalorder %s43_s24, %s43_s24 }
  0x1b   :  { %p2713_p11 = scmp.ne.s32.totalorder %s43_s24, %s2712_s12  ;;  %p2718_p13 = scmp.lt.s32.totalorder %s2712_s12, %s2712_s12 }
  0x1d   :  { %p2719_p0 = por %p2718_p13, %p2717_p12 }
  0x1f   :  { %p2720_p1 = pnand %p2719_p0, %p2713_p11 }
  0x21   :  { %2723 = shalt.err (!%p2720_p1)
}
  0x22   :  { %48 = dma.hbm_to_vmem [thread:$0]  %s3169_s5, 512, %s43_s24, [#allocation6], %s2753_s19, %s2753_s19, %s2754_s20  }
  0x23   :  { %2746 = dma.done.wait [#allocation3], 512  }
  0x24   :  { %2747 = vsyncadd [#allocation3], 4294966784 }
  0x25   :  { %2748 = dma.done.wait [#allocation6], 512  }
  0x26   :  { %2749 = vsyncadd [#allocation6], 4294966784  ;;  %v2756_v0 = vmov 0.0   ;;  %vm2757_vm0 = vmmov 0   ;;  %vm74_vm1 = vcmask 1043456   ;;  %vm70_vm2 = vcmask 31744  }
  0x27   :  { %2139 = vmatprep.subr.mxu0 %v2756_v0  ;;  %2141 = vmatprep.mubr.msk.f32.mxu0 %vm2757_vm0, %v2756_v0  ;;  %v62_v1 = vld [vmem:[%s3165_s1] sm:$0xf]  ;;  %v153_v4 = vld [vmem:[#allocation2 + $0x8] sm:$0xff]  ;;  %v154_v5 = vld [vmem:[#allocation2 + $0x10] sm:$0xff]  ;;  %v2758_v6 = vmov 0.0|0.0   ;;  %vm179_vm3 = vcmask 261120  }
  0x28   :  { %2152 = vmatprep.mubr.msk.f32.mxu1 %vm2757_vm0, %v2756_v0  ;;  %v61_v2 = vld [vmem:[%s3164_s0] sm:$0x3]  ;;  %2140 = vmatpush3.msk.msra.mxu0 %vm74_vm1, %v62_v1  ;;  %v155_v8 = vld [vmem:[#allocation2 + $0x18] sm:$0xff]  ;;  %v149_v15 = vld [vmem:[%s3166_s2 + $0x8] sm:$0xff]  ;;  %vm403_vm4 = vcmask 523264   ;;  %s2760_s10 = smov 4  }
  0x29   :  { %2142 = vmatmul.mubr.msk.f32.vlgmr.msra.gmra.mrb[0].mxu0 %vm70_vm2, %v61_v2  ;;  %v152_v3 = vld [vmem:[#allocation2] sm:$0xff]  ;;  %2453 = vmatprep.subr.bf16.mxu1 %v2758_v6  ;;  %v2862_v9 = vpack.c.bf16 %v155_v8, %v154_v5  ;;  %v150_v17 = vld [vmem:[%s3166_s2 + $0x10] sm:$0xff]  ;;  %v151_v18 = vld [vmem:[%s3166_s2 + $0x18] sm:$0xff]  ;;  %s2762_s13 = smov 20   ;;  %s2763_s14 = smov 16   ;;  %vm1936_vm5 = vcmask 64512  }
  0x2a   :  { %2163 = vmatprep.mubr.msk.f32.mxu0 %vm2757_vm0, %v2756_v0  ;;  %v2858_v7 = vpack.c.bf16 %v153_v4, %v152_v3  ;;  %2459 = vmatprep.subr.bf16.mxu0 %v2758_v6  ;;  %v1966_v10 = vld [vmem:[%s3167_s3] ss:$0 sm:$0xff]  ;;  %v2889_v20 = vpack.c.bf16 %v151_v18, %v150_v17  ;;  %v168_v22 = vld [vmem:[%s3171_s7 + $0x8] sm:$0xff]  ;;  %v169_v24 = vld [vmem:[%s3171_s7 + $0x10] sm:$0xff]  ;;  %s2765_s5 = smov 28   ;;  %vm1938_vm6 = vcmask 97280  }
  0x2b   :  { %v148_v14 = vld [vmem:[%s3166_s2] sm:$0xff]  ;;  %v170_v25 = vld [vmem:[%s3171_s7 + $0x18] sm:$0xff]  ;;  %v157_v35 = vld [vmem:[#allocation5 + $0x8] sm:$0xff]  ;;  %vm1940_vm7 = vcmask 130048   ;;  %vm1942_vm8 = vcmask 162816   ;;  %vm1944_vm9 = vcmask 195584  }
  0x2c   :  { %2455 = vmatpush3.bf16.msra.mxu1 %v2858_v7  ;;  %v2879_v16 = vpack.c.bf16 %v149_v15, %v148_v14  ;;  %v167_v21 = vld [vmem:[%s3171_s7] sm:$0xff]  ;;  %v2917_v26 = vpack.c.bf16 %v170_v25, %v169_v24  ;;  %s2759_s7 = smov 32   ;;  %v158_v37 = vld [vmem:[#allocation5 + $0x10] sm:$0xff]  ;;  %v159_v38 = vld [vmem:[#allocation5 + $0x18] sm:$0xff]  ;;  %s2766_s15 = smov [#allocation7]   ;;  %vm1946_vm10 = vcmask 228352  }
  0x2d   :  { %2456 = vmatprep.subr.bf16.mxu1 %v2758_v6  ;;  %v2905_v23 = vpack.c.bf16 %v168_v22, %v167_v21  ;;  %v2926_v27 = vld [vmem:[%s3170_s6] ss:$0 sm:$0xff]  ;;  %v2940_v39 = vpack.c.bf16 %v159_v38, %v158_v37  ;;  %s1956_s0 = sshll.u32 %s2766_s15, 4  ;;  %vm1948_vm11 = vcmask 254976   ;;  %s1957_s0 = int_to_ptr.vmem [resolvable:$true] %s1956_s0 }
  0x2e   :  { %v156_v34 = vld [vmem:[#allocation5] sm:$0xff]  ;;  %s2724_s1 = scalar_lea.vmem %s1957_s0, 32  ;;  %p2729_p3 = scmp.lt.s32.totalorder %s1957_s0, %s1957_s0 }
  0x2f   :  { %2461 = vmatpush3.bf16.msra.mxu0 %v2905_v23  ;;  %v2936_v36 = vpack.c.bf16 %v157_v35, %v156_v34  ;;  %p2725_p2 = scmp.ne.s32.totalorder %s1957_s0, %s2724_s1  ;;  %p2730_p4 = scmp.lt.s32.totalorder %s2724_s1, %s2724_s1 }
  0x30   :  { %2458 = vmatpush3.bf16.msra.mxu1 %v2862_v9  ;;  %2462 = vmatprep.subr.bf16.mxu0 %v2758_v6 }
  0x31   :  { %2465 = vmatprep.subr.bf16.mxu1 %v2758_v6  ;;  %p2731_p5 = por %p2730_p4, %p2729_p3 }
  0x33   :  { %2464 = vmatpush3.bf16.msra.mxu0 %v2917_v26  ;;  %p2732_p6 = pnand %p2731_p5, %p2725_p2 }
  0x34   :  { %2471 = vmatprep.subr.bf16.mxu0 %v2758_v6 }
  0xfc   :  { %v144_v11 = vpop.f32.mrb[0].mxu0 }
  0xfd   :  { %v2870_v12 = vadd.f32 %v1966_v10, %v144_v11  ;;  %v2143_v13 = vpop.f32.mrb[1].mxu0 }
  0xff   :  { %2648 = vtanh.f32 %v2870_v12 }
 0x109   :  { %v2649_v19 = vpop.eup %2648 }
 0x10a   :  { %2153 = vmatmul.mubr.msk.f32.vlgmr.msra.gmra.mrb[0].mxu1 %vm179_vm3, %v2649_v19 }
 0x10b   :  { %2467 = vmatpush3.bf16.msra.mxu1 %v2879_v16  ;;  %2174 = vmatprep.mubr.msk.f32.mxu1 %vm2757_vm0, %v2756_v0 }
 0x10c   :  { %2468 = vmatprep.subr.bf16.mxu1 %v2758_v6 }
 0x10f   :  { %2470 = vmatpush3.bf16.msra.mxu1 %v2889_v20 }
 0x110   :  { %2483 = vmatprep.subr.bf16.mxu1 %v2758_v6 }
 0x112   :  { %2175 = vmatmul.mubr.msk.f32.vlgmr.msra.gmra.mrb[2].mxu1 %vm179_vm3, %v2649_v19 }
 0x113   :  { %2204 = vmatprep.mubr.msk.f32.mxu1 %vm2757_vm0, %v2756_v0  ;;  %2485 = vmatpush3.bf16.msra.mxu1 %v2905_v23 }
 0x114   :  { %2486 = vmatprep.subr.bf16.mxu1 %v2758_v6 }
 0x117   :  { %2488 = vmatpush3.bf16.msra.mxu1 %v2917_v26 }
 0x118   :  { %2489 = vmatprep.subr.bf16.mxu1 %v2758_v6 }
 0x1dd   :  { %v249_v28 = vpop.f32.mrb[0].mxu1 }
 0x1de   :  { %v250_v29 = vadd.f32 %v2926_v27, %v249_v28  ;;  %v2154_v30 = vpop.f32.mrb[1].mxu1 }
 0x1e0   :  { %2650 = vtanh.f32 %v250_v29 }
 0x1e5   :  { %v393_v31 = vpop.f32.mrb[2].mxu1 }
 0x1e6   :  { %v2176_v32 = vpop.f32.mrb[3].mxu1  ;;  %v397_v40 = vadd.f32 %v393_v31, %v2870_v12 }
 0x1e8   :  { %2652 = vtanh.f32 %v397_v40 }
 0x1ea   :  { %v2651_v33 = vpop.eup %2650 }
 0x1eb   :  { %399 = vrot.lane.b32.xlu0 %v2651_v33, %s2759_s7  ;;  %2164 = vmatmul.mubr.msk.f32.vlgmr.msra.gmra.mrb[2].mxu0 %vm179_vm3, %v2651_v33 }
 0x1ec   :  { %2473 = vmatpush3.bf16.msra.mxu0 %v2858_v7  ;;  %2193 = vmatprep.mubr.msk.f32.mxu0 %vm2757_vm0, %v2756_v0 }
 0x1ed   :  { %2474 = vmatprep.subr.bf16.mxu0 %v2758_v6 }
 0x1f0   :  { %2476 = vmatpush3.bf16.msra.mxu0 %v2862_v9 }
 0x1f1   :  { %2477 = vmatprep.subr.bf16.mxu0 %v2758_v6 }
 0x1f2   :  { %v2653_v41 = vpop.eup %2652 }
 0x1f4   :  { %2479 = vmatpush3.bf16.msra.mxu0 %v2936_v36 }
 0x1f5   :  { %2480 = vmatprep.subr.bf16.mxu0 %v2758_v6 }
 0x1f8   :  { %2482 = vmatpush3.bf16.msra.mxu0 %v2940_v39 }
 0x1f9   :  { %2495 = vmatprep.subr.bf16.mxu0 %v2758_v6 }
 0x25d   :  { %v400_v42 = vpop.permute.xlu0 %399 }
 0x25e   :  { %v402_v43 = vsel %vm179_vm3, %v2653_v41, %v400_v42 }
 0x25f   :  { %2194 = vmatmul.mubr.msk.f32.vlgmr.msra.gmra.mrb[4].mxu0 %vm403_vm4, %v402_v43 }
 0x260   :  { %2497 = vmatpush3.bf16.msra.mxu0 %v2858_v7  ;;  %2234 = vmatprep.mubr.msk.f32.mxu0 %vm2757_vm0, %v2756_v0 }
 0x261   :  { %2498 = vmatprep.subr.bf16.mxu0 %v2758_v6 }
 0x264   :  { %2500 = vmatpush3.bf16.msra.mxu0 %v2862_v9 }
 0x265   :  { %2501 = vmatprep.subr.bf16.mxu0 %v2758_v6 }
 0x268   :  { %2503 = vmatpush3.bf16.msra.mxu0 %v2936_v36 }
 0x269   :  { %2504 = vmatprep.subr.bf16.mxu0 %v2758_v6 }
 0x26c   :  { %2506 = vmatpush3.bf16.msra.mxu0 %v2940_v39 }
 0x26d   :  { %2519 = vmatprep.subr.bf16.mxu0 %v2758_v6 }
 0x2be   :  { %v2958_v44 = vpop.f32.mrb[2].mxu0 }
 0x2bf   :  { %v2165_v45 = vpop.f32.mrb[3].mxu0 }
 0x332   :  { %v473_v46 = vpop.f32.mrb[4].mxu0 }
 0x333   :  { %v474_v47 = vadd.f32 %v2926_v27, %v473_v46  ;;  %v2195_v48 = vpop.f32.mrb[5].mxu0 }
 0x335   :  { %2654 = vtanh.f32 %v474_v47  ;;  %v3090_v47 = vld [vmem:[%s3172_s8] ss:$0 sm:$0xff]  ;;  %s2761_s8 = smov 12  }
 0x33f   :  { %v2655_v49 = vpop.eup %2654 }
 0x340   :  { %626 = vrot.lane.b32.xlu0 %v2655_v49, %s2759_s7  ;;  %2205 = vmatmul.mubr.msk.f32.vlgmr.msra.gmra.mrb[4].mxu1 %vm179_vm3, %v2655_v49 }
 0x341   :  { %2491 = vmatpush3.bf16.msra.mxu1 %v2879_v16  ;;  %2215 = vmatprep.mubr.msk.f32.mxu1 %vm2757_vm0, %v2756_v0 }
 0x342   :  { %2492 = vmatprep.subr.bf16.mxu1 %v2758_v6 }
 0x345   :  { %2494 = vmatpush3.bf16.msra.mxu1 %v2889_v20 }
 0x346   :  { %2507 = vmatprep.subr.bf16.mxu1 %v2758_v6 }
 0x348   :  { %2216 = vmatmul.mubr.msk.f32.vlgmr.msra.gmra.mrb[6].mxu1 %vm179_vm3, %v2653_v41 }
 0x349   :  { %2509 = vmatpush3.bf16.msra.mxu1 %v2905_v23  ;;  %2245 = vmatprep.mubr.msk.f32.mxu1 %vm2757_vm0, %v2756_v0 }
 0x34a   :  { %2510 = vmatprep.subr.bf16.mxu1 %v2758_v6 }
 0x34d   :  { %2512 = vmatpush3.bf16.msra.mxu1 %v2917_v26 }
 0x34e   :  { %2513 = vmatprep.subr.bf16.mxu1 %v2758_v6 }
 0x3b2   :  { %v627_v56 = vpop.permute.xlu0 %626 }
 0x413   :  { %v2976_v50 = vpop.f32.mrb[4].mxu1 }
 0x414   :  { %v2206_v51 = vpop.f32.mrb[5].mxu1  ;;  %v548_v48 = vadd.f32 %v3090_v47, %v2976_v50 }
 0x41b   :  { %v620_v52 = vpop.f32.mrb[6].mxu1 }
 0x41c   :  { %v624_v53 = vadd.f32 %v620_v52, %v2870_v12  ;;  %v2217_v54 = vpop.f32.mrb[7].mxu1 }
 0x41e   :  { %2656 = vtanh.f32 %v624_v53 }
 0x428   :  { %v2657_v55 = vpop.eup %2656 }
 0x429   :  { %v629_v57 = vsel %vm179_vm3, %v2657_v55, %v627_v56 }
 0x42a   :  { %2235 = vmatmul.mubr.msk.f32.vlgmr.msra.gmra.mrb[6].mxu0 %vm403_vm4, %v629_v57 }
 0x42b   :  { %2521 = vmatpush3.bf16.msra.mxu0 %v2858_v7  ;;  %2275 = vmatprep.mubr.msk.f32.mxu0 %vm2757_vm0, %v2756_v0 }
 0x42c   :  { %2522 = vmatprep.subr.bf16.mxu0 %v2758_v6 }
 0x42f   :  { %2524 = vmatpush3.bf16.msra.mxu0 %v2862_v9 }
 0x430   :  { %2525 = vmatprep.subr.bf16.mxu0 %v2758_v6 }
 0x433   :  { %2527 = vmatpush3.bf16.msra.mxu0 %v2936_v36 }
 0x434   :  { %2528 = vmatprep.subr.bf16.mxu0 %v2758_v6 }
 0x437   :  { %2530 = vmatpush3.bf16.msra.mxu0 %v2940_v39 }
 0x438   :  { %2543 = vmatprep.subr.bf16.mxu0 %v2758_v6 }
 0x4fd   :  { %v699_v58 = vpop.f32.mrb[6].mxu0 }
 0x4fe   :  { %v700_v59 = vadd.f32 %v2926_v27, %v699_v58  ;;  %v2236_v60 = vpop.f32.mrb[7].mxu0 }
 0x500   :  { %2658 = vtanh.f32 %v700_v59 }
 0x50a   :  { %v2659_v61 = vpop.eup %2658 }
 0x50b   :  { %852 = vrot.lane.b32.xlu1 %v2659_v61, %s2759_s7  ;;  %2246 = vmatmul.mubr.msk.f32.vlgmr.msra.gmra.mrb[8].mxu1 %vm179_vm3, %v2659_v61 }
 0x50c   :  { %2515 = vmatpush3.bf16.msra.mxu1 %v2879_v16  ;;  %2256 = vmatprep.mubr.msk.f32.mxu1 %vm2757_vm0, %v2756_v0 }
 0x50d   :  { %2516 = vmatprep.subr.bf16.mxu1 %v2758_v6 }
 0x510   :  { %2518 = vmatpush3.bf16.msra.mxu1 %v2889_v20 }
 0x511   :  { %2531 = vmatprep.subr.bf16.mxu1 %v2758_v6 }
 0x513   :  { %2257 = vmatmul.mubr.msk.f32.vlgmr.msra.gmra.mrb[10].mxu1 %vm179_vm3, %v2657_v55 }
 0x514   :  { %2533 = vmatpush3.bf16.msra.mxu1 %v2905_v23  ;;  %2286 = vmatprep.mubr.msk.f32.mxu1 %vm2757_vm0, %v2756_v0 }
 0x515   :  { %2534 = vmatprep.subr.bf16.mxu1 %v2758_v6 }
 0x518   :  { %2536 = vmatpush3.bf16.msra.mxu1 %v2917_v26 }
 0x519   :  { %2537 = vmatprep.subr.bf16.mxu1 %v2758_v6 }
 0x57d   :  { %v853_v5 = vpop.permute.xlu1 %852 }
 0x5de   :  { %v3007_v62 = vpop.f32.mrb[8].mxu1 }
 0x5df   :  { %v2247_v63 = vpop.f32.mrb[9].mxu1 }
 0x5e6   :  { %v846_v1 = vpop.f32.mrb[10].mxu1 }
 0x5e7   :  { %v850_v2 = vadd.f32 %v846_v1, %v2870_v12  ;;  %v2258_v3 = vpop.f32.mrb[11].mxu1 }
 0x5e9   :  { %2660 = vtanh.f32 %v850_v2 }
 0x5f3   :  { %v2661_v4 = vpop.eup %2660 }
 0x5f4   :  { %v855_v8 = vsel %vm179_vm3, %v2661_v4, %v853_v5 }
 0x5f5   :  { %2276 = vmatmul.mubr.msk.f32.vlgmr.msra.gmra.mrb[8].mxu0 %vm403_vm4, %v855_v8 }
 0x5f6   :  { %2545 = vmatpush3.bf16.msra.mxu0 %v2858_v7  ;;  %2316 = vmatprep.mubr.msk.f32.mxu0 %vm2757_vm0, %v2756_v0 }
 0x5f7   :  { %2546 = vmatprep.subr.bf16.mxu0 %v2758_v6 }
 0x5fa   :  { %2548 = vmatpush3.bf16.msra.mxu0 %v2862_v9 }
 0x5fb   :  { %2549 = vmatprep.subr.bf16.mxu0 %v2758_v6 }
 0x5fe   :  { %2551 = vmatpush3.bf16.msra.mxu0 %v2936_v36 }
 0x5ff   :  { %2552 = vmatprep.subr.bf16.mxu0 %v2758_v6 }
 0x602   :  { %2554 = vmatpush3.bf16.msra.mxu0 %v2940_v39 }
 0x603   :  { %2567 = vmatprep.subr.bf16.mxu0 %v2758_v6 }
 0x6c8   :  { %v925_v10 = vpop.f32.mrb[8].mxu0 }
 0x6c9   :  { %v926_v11 = vadd.f32 %v2926_v27, %v925_v10  ;;  %v2277_v13 = vpop.f32.mrb[9].mxu0 }
 0x6ca   :  { %v324_v13 = vadd.f32 %v3090_v47, %v2958_v44 }
 0x6cb   :  { %2662 = vtanh.f32 %v926_v11 }
 0x6d5   :  { %v2663_v14 = vpop.eup %2662 }
 0x6d6   :  { %1078 = vrot.lane.b32.xlu1 %v2663_v14, %s2759_s7  ;;  %2287 = vmatmul.mubr.msk.f32.vlgmr.msra.gmra.mrb[12].mxu1 %vm179_vm3, %v2663_v14 }
 0x6d7   :  { %2539 = vmatpush3.bf16.msra.mxu1 %v2879_v16  ;;  %2297 = vmatprep.mubr.msk.f32.mxu1 %vm2757_vm0, %v2756_v0 }
 0x6d8   :  { %2540 = vmatprep.subr.bf16.mxu1 %v2758_v6 }
 0x6db   :  { %2542 = vmatpush3.bf16.msra.mxu1 %v2889_v20 }
 0x6dc   :  { %2555 = vmatprep.subr.bf16.mxu1 %v2758_v6 }
 0x6de   :  { %2298 = vmatmul.mubr.msk.f32.vlgmr.msra.gmra.mrb[14].mxu1 %vm179_vm3, %v2661_v4 }
 0x6df   :  { %2557 = vmatpush3.bf16.msra.mxu1 %v2905_v23  ;;  %2327 = vmatprep.mubr.msk.f32.mxu1 %vm2757_vm0, %v2756_v0 }
 0x6e0   :  { %2558 = vmatprep.subr.bf16.mxu1 %v2758_v6 }
 0x6e3   :  { %2560 = vmatpush3.bf16.msra.mxu1 %v2917_v26 }
 0x6e4   :  { %2561 = vmatprep.subr.bf16.mxu1 %v2758_v6 }
 0x748   :  { %v1079_v24 = vpop.permute.xlu1 %1078 }
 0x7a9   :  { %v3038_v15 = vpop.f32.mrb[12].mxu1 }
 0x7aa   :  { %v2288_v17 = vpop.f32.mrb[13].mxu1  ;;  %v1000_v49 = vadd.f32 %v3090_v47, %v3038_v15 }
 0x7b1   :  { %v1072_v18 = vpop.f32.mrb[14].mxu1 }
 0x7b2   :  { %v1076_v19 = vadd.f32 %v1072_v18, %v2870_v12  ;;  %v2299_v21 = vpop.f32.mrb[15].mxu1 }
 0x7b4   :  { %2664 = vtanh.f32 %v1076_v19 }
 0x7be   :  { %v2665_v22 = vpop.eup %2664 }
 0x7bf   :  { %v1081_v25 = vsel %vm179_vm3, %v2665_v22, %v1079_v24 }
 0x7c0   :  { %2317 = vmatmul.mubr.msk.f32.vlgmr.msra.gmra.mrb[10].mxu0 %vm403_vm4, %v1081_v25 }
 0x7c1   :  { %2569 = vmatpush3.bf16.msra.mxu0 %v2858_v7  ;;  %2357 = vmatprep.mubr.msk.f32.mxu0 %vm2757_vm0, %v2756_v0 }
 0x7c2   :  { %2570 = vmatprep.subr.bf16.mxu0 %v2758_v6 }
 0x7c5   :  { %2572 = vmatpush3.bf16.msra.mxu0 %v2862_v9 }
 0x7c6   :  { %2573 = vmatprep.subr.bf16.mxu0 %v2758_v6 }
 0x7c9   :  { %2575 = vmatpush3.bf16.msra.mxu0 %v2936_v36 }
 0x7ca   :  { %2576 = vmatprep.subr.bf16.mxu0 %v2758_v6 }
 0x7cd   :  { %2578 = vmatpush3.bf16.msra.mxu0 %v2940_v39 }
 0x7ce   :  { %2591 = vmatprep.subr.bf16.mxu0 %v2758_v6 }
 0x893   :  { %v1151_v28 = vpop.f32.mrb[10].mxu0 }
 0x894   :  { %v1152_v29 = vadd.f32 %v2926_v27, %v1151_v28  ;;  %v2318_v30 = vpop.f32.mrb[11].mxu0 }
 0x896   :  { %2666 = vtanh.f32 %v1152_v29 }
 0x8a0   :  { %v2667_v31 = vpop.eup %2666 }
 0x8a1   :  { %1304 = vrot.lane.b32.xlu0 %v2667_v31, %s2759_s7  ;;  %2328 = vmatmul.mubr.msk.f32.vlgmr.msra.gmra.mrb[16].mxu1 %vm179_vm3, %v2667_v31 }
 0x8a2   :  { %2563 = vmatpush3.bf16.msra.mxu1 %v2879_v16  ;;  %2338 = vmatprep.mubr.msk.f32.mxu1 %vm2757_vm0, %v2756_v0 }
 0x8a3   :  { %2564 = vmatprep.subr.bf16.mxu1 %v2758_v6 }
 0x8a6   :  { %2566 = vmatpush3.bf16.msra.mxu1 %v2889_v20 }
 0x8a7   :  { %2579 = vmatprep.subr.bf16.mxu1 %v2758_v6 }
 0x8a9   :  { %2339 = vmatmul.mubr.msk.f32.vlgmr.msra.gmra.mrb[18].mxu1 %vm179_vm3, %v2665_v22 }
 0x8aa   :  { %2581 = vmatpush3.bf16.msra.mxu1 %v2905_v23  ;;  %2368 = vmatprep.mubr.msk.f32.mxu1 %vm2757_vm0, %v2756_v0 }
 0x8ab   :  { %2582 = vmatprep.subr.bf16.mxu1 %v2758_v6 }
 0x8ae   :  { %2584 = vmatpush3.bf16.msra.mxu1 %v2917_v26 }
 0x8af   :  { %2585 = vmatprep.subr.bf16.mxu1 %v2758_v6 }
 0x913   :  { %v1305_v40 = vpop.permute.xlu0 %1304 }
 0x974   :  { %v3069_v32 = vpop.f32.mrb[16].mxu1 }
 0x975   :  { %v2329_v33 = vpop.f32.mrb[17].mxu1 }
 0x97c   :  { %v1298_v34 = vpop.f32.mrb[18].mxu1 }
 0x97d   :  { %v1302_v35 = vadd.f32 %v1298_v34, %v2870_v12  ;;  %v2340_v37 = vpop.f32.mrb[19].mxu1 }
 0x97f   :  { %2668 = vtanh.f32 %v1302_v35 }
 0x989   :  { %v2669_v38 = vpop.eup %2668 }
 0x98a   :  { %v1307_v41 = vsel %vm179_vm3, %v2669_v38, %v1305_v40 }
 0x98b   :  { %2358 = vmatmul.mubr.msk.f32.vlgmr.msra.gmra.mrb[12].mxu0 %vm403_vm4, %v1307_v41 }
 0x98c   :  { %2593 = vmatpush3.bf16.msra.mxu0 %v2858_v7  ;;  %2398 = vmatprep.mubr.msk.f32.mxu0 %vm2757_vm0, %v2756_v0 }
 0x98d   :  { %2594 = vmatprep.subr.bf16.mxu0 %v2758_v6 }
 0x990   :  { %2596 = vmatpush3.bf16.msra.mxu0 %v2862_v9 }
 0x991   :  { %2597 = vmatprep.subr.bf16.mxu0 %v2758_v6 }
 0x994   :  { %2599 = vmatpush3.bf16.msra.mxu0 %v2936_v36 }
 0x995   :  { %2600 = vmatprep.subr.bf16.mxu0 %v2758_v6 }
 0x998   :  { %2602 = vmatpush3.bf16.msra.mxu0 %v2940_v39 }
 0x999   :  { %2615 = vmatprep.subr.bf16.mxu0 %v2758_v6 }
 0xa5e   :  { %v1377_v42 = vpop.f32.mrb[12].mxu0 }
 0xa5f   :  { %v1378_v43 = vadd.f32 %v2926_v27, %v1377_v42  ;;  %v2359_v45 = vpop.f32.mrb[13].mxu0 }
 0xa61   :  { %2670 = vtanh.f32 %v1378_v43 }
 0xa6b   :  { %v2671_v46 = vpop.eup %2670 }
 0xa6c   :  { %1530 = vrot.lane.b32.xlu1 %v2671_v46, %s2759_s7  ;;  %2369 = vmatmul.mubr.msk.f32.vlgmr.msra.gmra.mrb[20].mxu1 %vm179_vm3, %v2671_v46 }
 0xa6d   :  { %2587 = vmatpush3.bf16.msra.mxu1 %v2879_v16  ;;  %2379 = vmatprep.mubr.msk.f32.mxu1 %vm2757_vm0, %v2756_v0 }
 0xa6e   :  { %2588 = vmatprep.subr.bf16.mxu1 %v2758_v6 }
 0xa70   :  { %1908 = vrot.lane.b32.xlu1 %v548_v48, %s2760_s10 }
 0xa71   :  { %2590 = vmatpush3.bf16.msra.mxu1 %v2889_v20 }
 0xa72   :  { %2603 = vmatprep.subr.bf16.mxu1 %v2758_v6 }
 0xa74   :  { %2380 = vmatmul.mubr.msk.f32.vlgmr.msra.gmra.mrb[22].mxu1 %vm179_vm3, %v2669_v38  ;;  %1916 = vrot.lane.b32.xlu1 %v1000_v49, %s2761_s8 }
 0xa75   :  { %2605 = vmatpush3.bf16.msra.mxu1 %v2905_v23  ;;  %2409 = vmatprep.mubr.msk.f32.mxu1 %vm2757_vm0, %v2756_v0 }
 0xa76   :  { %2606 = vmatprep.subr.bf16.mxu1 %v2758_v6 }
 0xa79   :  { %2608 = vmatpush3.bf16.msra.mxu1 %v2917_v26 }
 0xa7a   :  { %2609 = vmatprep.subr.bf16.mxu1 %v2758_v6 }
 0xade   :  { %v1531_v57 = vpop.permute.xlu1 %1530 }
 0xae2   :  { %v1909_v10 = vpop.permute.xlu1 %1908 }
 0xae3   :  { %v1935_v14 = vsel %vm70_vm2, %v324_v13, %v1909_v10 }
 0xb3f   :  { %v1451_v50 = vpop.f32.mrb[20].mxu1 }
 0xb40   :  { %v1452_v51 = vadd.f32 %v3090_v47, %v1451_v50  ;;  %v2370_v52 = vpop.f32.mrb[21].mxu1 }
 0xb42   :  { %1924 = vrot.lane.b32.xlu1 %v1452_v51, %s2762_s13 }
 0xb47   :  { %v1524_v53 = vpop.f32.mrb[22].mxu1 }
 0xb48   :  { %v1528_v54 = vadd.f32 %v1524_v53, %v2870_v12  ;;  %v2381_v55 = vpop.f32.mrb[23].mxu1 }
 0xb4a   :  { %2672 = vtanh.f32 %v1528_v54 }
 0xb54   :  { %v2673_v56 = vpop.eup %2672 }
 0xb55   :  { %v1533_v58 = vsel %vm179_vm3, %v2673_v56, %v1531_v57 }
 0xb56   :  { %2399 = vmatmul.mubr.msk.f32.vlgmr.msra.gmra.mrb[14].mxu0 %vm403_vm4, %v1533_v58 }
 0xb57   :  { %2617 = vmatpush3.bf16.msra.mxu0 %v2858_v7  ;;  %2439 = vmatprep.mubr.msk.f32.mxu0 %vm2757_vm0, %v2756_v0 }
 0xb58   :  { %2618 = vmatprep.subr.bf16.mxu0 %v2758_v6 }
 0xb5b   :  { %2620 = vmatpush3.bf16.msra.mxu0 %v2862_v9  ;;  %v774_v9 = vadd.f32 %v3090_v47, %v3007_v62 }
 0xb5c   :  { %2621 = vmatprep.subr.bf16.mxu0 %v2758_v6 }
 0xb5f   :  { %2623 = vmatpush3.bf16.msra.mxu0 %v2936_v36  ;;  %v1226_v36 = vadd.f32 %v3090_v47, %v3069_v32 }
 0xb60   :  { %2624 = vmatprep.subr.bf16.mxu0 %v2758_v6 }
 0xb63   :  { %2626 = vmatpush3.bf16.msra.mxu0 %v2940_v39 }
 0xc29   :  { %v1603_v59 = vpop.f32.mrb[14].mxu0 }
 0xc2a   :  { %v1604_v60 = vadd.f32 %v2926_v27, %v1603_v59  ;;  %v2400_v61 = vpop.f32.mrb[15].mxu0 }
 0xc2c   :  { %2674 = vtanh.f32 %v1604_v60 }
 0xc36   :  { %v2675_v7 = vpop.eup %2674 }
 0xc37   :  { %1756 = vrot.lane.b32.xlu0 %v2675_v7, %s2759_s7  ;;  %2410 = vmatmul.mubr.msk.f32.vlgmr.msra.gmra.mrb[24].mxu1 %vm179_vm3, %v2675_v7 }
 0xc38   :  { %2611 = vmatpush3.bf16.msra.mxu1 %v2879_v16  ;;  %2420 = vmatprep.mubr.msk.f32.mxu1 %vm2757_vm0, %v2756_v0 }
 0xc39   :  { %2612 = vmatprep.subr.bf16.mxu1 %v2758_v6 }
 0xc3b   :  { %1912 = vrot.lane.b32.xlu0 %v774_v9, %s2754_s20  ;;  %s2764_s20 = smov 24  }
 0xc3c   :  { %2614 = vmatpush3.bf16.msra.mxu1 %v2889_v20 }
 0xc3d   :  { %2627 = vmatprep.subr.bf16.mxu1 %v2758_v6 }
 0xc3f   :  { %2421 = vmatmul.mubr.msk.f32.vlgmr.msra.gmra.mrb[26].mxu1 %vm179_vm3, %v2673_v56  ;;  %1920 = vrot.lane.b32.xlu0 %v1226_v36, %s2763_s14 }
 0xc40   :  { %2629 = vmatpush3.bf16.msra.mxu1 %v2905_v23  ;;  %2450 = vmatprep.mubr.msk.f32.mxu1 %vm2757_vm0, %v2756_v0 }
 0xc41   :  { %2630 = vmatprep.subr.bf16.mxu1 %v2758_v6 }
 0xc44   :  { %2632 = vmatpush3.bf16.msra.mxu1 %v2917_v26 }
 0xca9   :  { %v1757_v23 = vpop.permute.xlu0 %1756 }
 0xcad   :  { %v1913_v11 = vpop.permute.xlu0 %1912 }
 0xcae   :  { %v1937_v15 = vsel %vm1936_vm5, %v1935_v14, %v1913_v11 }
 0xcb1   :  { %v1921_v17 = vpop.permute.xlu0 %1920 }
 0xd0a   :  { %v1677_v16 = vpop.f32.mrb[24].mxu1 }
 0xd0b   :  { %v1678_v20 = vadd.f32 %v3090_v47, %v1677_v16  ;;  %v2411_v39 = vpop.f32.mrb[25].mxu1 }
 0xd0d   :  { %1928 = vrot.lane.b32.xlu0 %v1678_v20, %s2764_s20 }
 0xd12   :  { %v1750_v62 = vpop.f32.mrb[26].mxu1 }
 0xd13   :  { %v1754_v63 = vadd.f32 %v1750_v62, %v2870_v12  ;;  %v2422_v1 = vpop.f32.mrb[27].mxu1 }
 0xd15   :  { %2676 = vtanh.f32 %v1754_v63 }
 0xd1f   :  { %v2677_v2 = vpop.eup %2676 }
 0xd20   :  { %v1759_v3 = vsel %vm179_vm3, %v2677_v2, %v1757_v23 }
 0xd21   :  { %2440 = vmatmul.mubr.msk.f32.vlgmr.msra.gmra.mrb[16].mxu0 %vm403_vm4, %v1759_v3 }
 0xd7f   :  { %v1929_v22 = vpop.permute.xlu0 %1928 }
 0xdf4   :  { %v1829_v0 = vpop.f32.mrb[16].mxu0 }
 0xdf5   :  { %v1830_v6 = vadd.f32 %v2926_v27, %v1829_v0  ;;  %v2441_v26 = vpop.f32.mrb[17].mxu0  ;;  %v1917_v27 = vpop.permute.xlu1 %1916 }
 0xdf6   :  { %v1939_v18 = vsel %vm1938_vm6, %v1937_v15, %v1917_v27 }
 0xdf7   :  { %2678 = vtanh.f32 %v1830_v6  ;;  %v1941_v21 = vsel %vm1940_vm7, %v1939_v18, %v1921_v17 }
 0xdf9   :  { %v1925_v19 = vpop.permute.xlu1 %1924 }
 0xdfa   :  { %v1943_v24 = vsel %vm1942_vm8, %v1941_v21, %v1925_v19 }
 0xdfb   :  { %v1945_v44 = vsel %vm1944_vm9, %v1943_v24, %v1929_v22 }
 0xe01   :  { %v2679_v4 = vpop.eup %2678 }
 0xe02   :  { %2451 = vmatmul.mubr.msk.f32.vlgmr.msra.gmra.mrb[28].mxu1 %vm179_vm3, %v2679_v4 }
 0xed5   :  { %v1903_v5 = vpop.f32.mrb[28].mxu1 }
 0xed6   :  { %v1904_v8 = vadd.f32 %v3090_v47, %v1903_v5  ;;  %v2452_v12 = vpop.f32.mrb[29].mxu1 }
 0xed8   :  { %1932 = vrot.lane.b32.xlu1 %v1904_v8, %s2765_s5 }
 0xf4a   :  { %v1933_v25 = vpop.permute.xlu1 %1932 }
 0xf4b   :  { %v1947_v28 = vsel %vm1946_vm10, %v1945_v44, %v1933_v25 }
 0xf4c   :  { %1949 = vst.msk [vmem:[#allocation7] sm:$0x3] %vm1948_vm11, %v1947_v28 }
 0xf4d   :  { %2735 = shalt.err (!%p2732_p6)
}
 0xf4e   :  { %s2736_s18 = scalar_lea.hbm %s3173_s9, 32 }
 0xf4f   :  { %p2737_p7 = scmp.ne.s32.totalorder %s3173_s9, %s2736_s18  ;;  %p2740_p8 = scmp.lt.u32.totalorder %s2736_s18, %s3173_s9 }
 0xf51   :  { %p2742_p9 = pnand %p2740_p8, %p2737_p7 }
 0xf53   :  { %2745 = shalt.err (!%p2742_p9)
}
 0xf54   :  { %1959 = dma.vmem_to_hbm [thread:$0]  %s1957_s0, 32, %s3173_s9, [#allocation4]  }
 0xf55   :  { %2750 = dma.done.wait [#allocation4], 32  }
 0xf56   :  { %2751 = vsyncadd [#allocation4], 4294967264 }
 0xf57   :  { %1963 = vsyncpa [#allocation3], 1 }
 0xf58   :  { %1964 = vsyncpa [#allocation6], 1 }
 0xf59   :  { %1965 = vsyncpa [#allocation4], 1 }

</bundles_post_ra>
